<compile_context>
chip_gen: v7x
topology: tpu7x:2x2x1
jax: 0.10.0
libtpu: 0.0.40
codegen_flags: <defaults>
</compile_context>

<pallas_src>
import jax
import jax.numpy as jnp
from jax.experimental import pallas as pl
from jax.experimental.pallas import tpu as pltpu

MAX_CMD = 0.5
LANE = 128


def _actor_kernel(xin_ref, h0c0_ref, wa_ref, wg_ref, b_ref,
                  out_ref, state_ref, hc_scr):
    """One LSTM timestep for one batch tile.

    grid = (batch_blocks, T); time is the innermost ("arbitrary") axis, so the
    recurrent state lives in VMEM scratch across timesteps and the weights
    (constant index_map) stay VMEM-resident for the whole call.
    """
    t = pl.program_id(1)

    # t == 0: load the initial (h0, c0) for this batch tile into the carried
    # VMEM state scratch. Padded lanes/rows are zero and stay zero.
    @pl.when(t == 0)
    def _():
        hc_scr[...] = h0c0_ref[...]

    h_prev = hc_scr[:, 0 * LANE:1 * LANE]        # (Bt, 128) f32, valid [:H2]
    c_prev = hc_scr[:, 1 * LANE:2 * LANE]

    # 128-aligned views of the bias slab (1, 896) -> free vreg views.
    b_pre = b_ref[:, 0 * LANE:1 * LANE]
    b1 = b_ref[:, 1 * LANE:2 * LANE]
    b_g = b_ref[:, 2 * LANE:6 * LANE]            # b_ih + b_hh, per-gate blocks
    b3 = b_ref[:, 6 * LANE:7 * LANE]

    # 128-aligned row views of the bf16 weight slabs.
    w_pre = wa_ref[0 * LANE:1 * LANE, :]         # xin-layout rows (laser part)
    w1_obs = wa_ref[1 * LANE:2 * LANE, :]        # xin-layout rows (obs part)
    w1_las = wa_ref[2 * LANE:3 * LANE, :]        # pre-layout rows
    w3 = wa_ref[3 * LANE:4 * LANE, :]            # h-layout rows
    w_ih = wg_ref[0 * LANE:1 * LANE, :]          # x-layout rows
    w_hh = wg_ref[1 * LANE:2 * LANE, :]          # h-layout rows

    xin = xin_ref[...]                           # (Bt, 128) bf16 [obs|laser|0]
    h_bf = h_prev.astype(jnp.bfloat16)

    # PreFC + ReLU (only the laser rows of w_pre are nonzero).
    pre = jnp.maximum(
        jnp.dot(xin, w_pre, preferred_element_type=jnp.float32) + b_pre, 0.0)

    # FC1 on concat([obs, pre]) as two K=128 dots (no concat temp): the obs
    # contribution comes straight from the packed xin block.
    x = jnp.maximum(
        jnp.dot(xin, w1_obs, preferred_element_type=jnp.float32)
        + jnp.dot(pre.astype(jnp.bfloat16), w1_las,
                  preferred_element_type=jnp.float32)
        + b1, 0.0)

    # LSTM gates; the recurrent (h @ W_hh) dot is off the pre->fc1->gates
    # critical path. Each gate occupies a 128-lane-aligned column block.
    gates = (jnp.dot(x.astype(jnp.bfloat16), w_ih,
                     preferred_element_type=jnp.float32)
             + jnp.dot(h_bf, w_hh, preferred_element_type=jnp.float32)
             + b_g)                              # (Bt, 512) f32

    i_g = jax.nn.sigmoid(gates[:, 0 * LANE:1 * LANE])
    f_g = jax.nn.sigmoid(gates[:, 1 * LANE:2 * LANE])
    g_g = jnp.tanh(gates[:, 2 * LANE:3 * LANE])
    o_g = jax.nn.sigmoid(gates[:, 3 * LANE:4 * LANE])

    c_new = f_g * c_prev + i_g * g_g             # state math stays f32
    h_new = o_g * jnp.tanh(c_new)

    out = jnp.tanh(
        jnp.dot(h_new.astype(jnp.bfloat16), w3,
                preferred_element_type=jnp.float32) + b3) * MAX_CMD

    # Per-timestep action output: one unmasked full-width 128-lane store.
    out_ref[...] = out

    # Carry the state to the next timestep (direct aligned sub-stores).
    hc_scr[:, 0 * LANE:1 * LANE] = h_new
    hc_scr[:, 1 * LANE:2 * LANE] = c_new

    # Final (h, c) written once per batch tile, on the last timestep.
    @pl.when(t == pl.num_programs(1) - 1)
    def _():
        state_ref[:, 0 * LANE:1 * LANE] = h_new
        state_ref[:, 1 * LANE:2 * LANE] = c_new


def pack_params(params, dim_obs, dim_laser, las_output, hidden_layer, h2,
                dim_action):
    """One-time host-side packing into lane-dense, 128-aligned slabs.
    Weight slabs are bf16 (MXU operands); biases stay f32. All padding is 0."""
    assert dim_obs + dim_laser <= LANE, "obs+laser must fit one 128-lane block"
    assert max(las_output, hidden_layer, h2, dim_action) <= LANE
    f32 = jnp.float32

    # Weight slab A (512, 128). Row blocks are keyed to the operand feeding
    # them; unused rows/cols are zero:
    #   [  0:128] xin-layout -> PreFC  (w_pre at the laser lane offset)
    #   [128:256] xin-layout -> FC1    (w1_obs at the obs lane offset)
    #   [256:384] pre-layout -> FC1    (w1_las)
    #   [384:512] h-layout   -> FC3    (w3)
    wa = jnp.zeros((4 * LANE, LANE), f32)
    wa = wa.at[dim_obs:dim_obs + dim_laser, :las_output].set(params["w_pre"])
    wa = wa.at[1 * LANE:1 * LANE + dim_obs, :hidden_layer].set(params["w1_obs"])
    wa = wa.at[2 * LANE:2 * LANE + las_output, :hidden_layer].set(
        params["w1_las"])
    wa = wa.at[3 * LANE:3 * LANE + h2, :dim_action].set(params["w3"])

    # Gate weight slab (256, 512): rows [0:128]=W_ih (x-layout), rows
    # [128:256]=W_hh (h-layout). Gate k (i,f,g,o) occupies the 128-aligned
    # column block [k*128 : k*128+h2]. b_ih + b_hh are pre-summed.
    wg = jnp.zeros((2 * LANE, 4 * LANE), f32)
    bg = jnp.zeros((1, 4 * LANE), f32)
    for k in range(4):
        wg = wg.at[:hidden_layer, k * LANE:k * LANE + h2].set(
            params["w_ih"][:, k * h2:(k + 1) * h2])
        wg = wg.at[LANE:LANE + h2, k * LANE:k * LANE + h2].set(
            params["w_hh"][:, k * h2:(k + 1) * h2])
        bg = bg.at[:, k * LANE:k * LANE + h2].set(
            params["b_ih"][:, k * h2:(k + 1) * h2]
            + params["b_hh"][:, k * h2:(k + 1) * h2])

    # Bias slab (1, 896): [b_pre | b1 | b_gates(512) | b3], 128-aligned blocks.
    b_pre_p = jnp.zeros((1, LANE), f32).at[:, :las_output].set(params["b_pre"])
    b1_p = jnp.zeros((1, LANE), f32).at[:, :hidden_layer].set(params["b1"])
    b3_p = jnp.zeros((1, LANE), f32).at[:, :dim_action].set(params["b3"])
    bias = jnp.concatenate([b_pre_p, b1_p, bg, b3_p], axis=1)    # (1, 896) f32

    return {"wa": wa.astype(jnp.bfloat16),
            "wg": wg.astype(jnp.bfloat16),
            "bias": bias}


def _batch_tiling(B):
    """Choose (padded batch, batch tile, n_blocks). Single tile up to 512
    rows; larger batches use >=2 tiles (each <=1024, 8-aligned) so the
    "parallel" batch axis shards across both TensorCores on v7x."""
    Bp = -(-B // 8) * 8
    if Bp <= 512:
        return Bp, Bp, 1
    block_b = min(1024, -(-(Bp // 2) // 8) * 8)
    Bp = -(-Bp // block_b) * block_b
    return Bp, block_b, Bp // block_b


def actor_rollout(obs_seq, laser_seq, hidden, packed, *, dim_action):
    """Run T LSTM steps of the actor in ONE pallas_call.

    obs_seq: (T, B, dim_obs), laser_seq: (T, B, dim_laser),
    hidden: (h0, c0) each (1, B, H2)  (PyTorch LSTM convention).
    Returns (outs (T, B, dim_action), (hT, cT) each (1, B, H2))."""
    h0, c0 = hidden
    T, B, dim_obs = obs_seq.shape
    dim_laser = laser_seq.shape[2]
    H2 = h0.shape[-1]

    Bp, block_b, n_blocks = _batch_tiling(B)

    # Packed per-timestep activation slab: [obs | laser | 0] in ONE 128-lane
    # block, bf16 (operand selection happens via zero-padded weight rows).
    xin = jnp.zeros((T, Bp, LANE), jnp.float32)
    xin = xin.at[:, :B, :dim_obs].set(obs_seq.astype(jnp.float32))
    xin = xin.at[:, :B, dim_obs:dim_obs + dim_laser].set(
        laser_seq.astype(jnp.float32))
    xin = xin.astype(jnp.bfloat16)

    # Initial state slab [h0 | c0], f32, read only at t == 0.
    h0c0 = jnp.zeros((Bp, 2 * LANE), jnp.float32)
    h0c0 = h0c0.at[:B, :H2].set(h0.reshape(B, H2).astype(jnp.float32))
    h0c0 = h0c0.at[:B, LANE:LANE + H2].set(c0.reshape(B, H2).astype(jnp.float32))

    out_seq, state = pl.pallas_call(
        _actor_kernel,
        out_shape=(
            jax.ShapeDtypeStruct((T, Bp, LANE), jnp.float32),    # per-step out
            jax.ShapeDtypeStruct((Bp, 2 * LANE), jnp.float32),   # final [h|c]
        ),
        grid_spec=pltpu.PrefetchScalarGridSpec(
            num_scalar_prefetch=0,
            grid=(n_blocks, T),
            in_specs=[
                pl.BlockSpec((None, block_b, LANE), lambda b, t: (t, b, 0)),
                pl.BlockSpec((block_b, 2 * LANE), lambda b, t: (b, 0)),
                pl.BlockSpec((4 * LANE, LANE), lambda b, t: (0, 0)),      # wa
                pl.BlockSpec((2 * LANE, 4 * LANE), lambda b, t: (0, 0)),  # wg
                pl.BlockSpec((1, 7 * LANE), lambda b, t: (0, 0)),         # bias
            ],
            out_specs=(
                pl.BlockSpec((None, block_b, LANE), lambda b, t: (t, b, 0)),
                pl.BlockSpec((block_b, 2 * LANE), lambda b, t: (b, 0)),
            ),
            scratch_shapes=[pltpu.VMEM((block_b, 2 * LANE), jnp.float32)],
        ),
        compiler_params=pltpu.CompilerParams(
            dimension_semantics=("parallel", "arbitrary"),
            vmem_limit_bytes=32 * 1024 * 1024),
    )(xin, h0c0, packed["wa"], packed["wg"], packed["bias"])

    outs = out_seq[:, :B, :dim_action]
    h1 = state[:B, :H2].reshape(1, B, H2)
    c1 = state[:B, LANE:LANE + H2].reshape(1, B, H2)
    return outs, (h1, c1)


def actor_forward(obs, laser, hidden, packed, *, dim_action):
    """Single-step forward, exactly matching the PyTorch module."""
    outs, (h1, c1) = actor_rollout(obs[None], laser[None], hidden, packed,
                                   dim_action=dim_action)
    return outs[0], (h1, c1)


def _reference_forward(obs, laser, hidden, params):
    """Pure-JAX f32 reference with identical semantics (for verification)."""
    h0, c0 = hidden
    B, H2 = obs.shape[0], h0.shape[-1]
    h0, c0 = h0.reshape(B, H2), c0.reshape(B, H2)
    pre = jax.nn.relu(laser @ params["w_pre"] + params["b_pre"])
    x = jax.nn.relu(obs @ params["w1_obs"] + pre @ params["w1_las"]
                    + params["b1"])
    gates = (x @ params["w_ih"] + params["b_ih"]
             + h0 @ params["w_hh"] + params["b_hh"])
    i_g = jax.nn.sigmoid(gates[:, 0 * H2:1 * H2])
    f_g = jax.nn.sigmoid(gates[:, 1 * H2:2 * H2])
    g_g = jnp.tanh(gates[:, 2 * H2:3 * H2])
    o_g = jax.nn.sigmoid(gates[:, 3 * H2:4 * H2])
    c1 = f_g * c0 + i_g * g_g
    h1 = o_g * jnp.tanh(c1)
    out = jnp.tanh(h1 @ params["w3"] + params["b3"]) * MAX_CMD
    return out, (h1.reshape(1, B, H2), c1.reshape(1, B, H2))


def _reference_rollout(obs_seq, laser_seq, hidden, params):
    outs, h = [], hidden
    for t in range(obs_seq.shape[0]):
        o, h = _reference_forward(obs_seq[t], laser_seq[t], h, params)
        outs.append(o)
    return jnp.stack(outs), h


def make_params(key, dim_obs, dim_action, dim_laser, las_output,
                hidden_layer, second_hidden_layer):
    ks = jax.random.split(key, 10)
    s = 0.1

    def w(k, shape):
        return (s * jax.random.normal(k, shape)).astype(jnp.float32)

    return {
        "w_pre": w(ks[0], (dim_laser, las_output)),
        "b_pre": w(ks[1], (1, las_output)),
        "w1_obs": w(ks[2], (dim_obs, hidden_layer)),
        "w1_las": w(ks[3], (las_output, hidden_layer)),
        "b1": w(ks[4], (1, hidden_layer)),
        "w_ih": w(ks[5], (hidden_layer, 4 * second_hidden_layer)),
        "b_ih": w(ks[6], (1, 4 * second_hidden_layer)),
        "w_hh": w(ks[7], (second_hidden_layer, 4 * second_hidden_layer)),
        "b_hh": w(ks[8], (1, 4 * second_hidden_layer)),
        "w3": w(ks[9], (second_hidden_layer, dim_action)),
        "b3": jnp.zeros((1, dim_action), jnp.float32),
    }


if __name__ == "__main__":
    # Small shapes consistent with the module's forward ("3action" actor).
    B, T = 4, 6
    dim_observation = 16
    dim_laser = 32
    las_output = 16
    hidden_layer = 32
    second_hidden_layer = 32
    dim_action = 3

    key = jax.random.PRNGKey(0)
    k_obs, k_las, k_h, k_c, k_par = jax.random.split(key, 5)

    obs_seq = jax.random.normal(k_obs, (T, B, dim_observation), jnp.float32)
    laser_seq = jax.random.normal(k_las, (T, B, dim_laser), jnp.float32)
    h0 = jax.random.normal(k_h, (1, B, second_hidden_layer), jnp.float32)
    c0 = jax.random.normal(k_c, (1, B, second_hidden_layer), jnp.float32)

    params = make_params(k_par, dim_observation, dim_action, dim_laser,
                         las_output, hidden_layer, second_hidden_layer)
    packed = pack_params(params, dim_observation, dim_laser, las_output,
                         hidden_layer, second_hidden_layer, dim_action)

    # 1) Single LSTM step -- exact module semantics.
    out, (h1, c1) = actor_forward(obs_seq[0], laser_seq[0], (h0, c0), packed,
                                  dim_action=dim_action)
    jax.block_until_ready((out, h1, c1))

    ref_out, (ref_h1, ref_c1) = _reference_forward(obs_seq[0], laser_seq[0],
                                                   (h0, c0), params)
    # bf16 matmul operands (f32 accumulate / state) => relaxed tolerance.
    assert jnp.allclose(out, ref_out, atol=2e-2, rtol=2e-2)
    assert jnp.allclose(h1, ref_h1, atol=2e-2, rtol=2e-2)
    assert jnp.allclose(c1, ref_c1, atol=2e-2, rtol=2e-2)
    assert out.shape == (B, dim_action)
    assert h1.shape == (1, B, second_hidden_layer)
    assert c1.shape == (1, B, second_hidden_layer)

    # 2) T-step rollout -- one pallas_call, time grid axis, state in VMEM.
    outs, (hT, cT) = actor_rollout(obs_seq, laser_seq, (h0, c0), packed,
                                   dim_action=dim_action)
    jax.block_until_ready((outs, hT, cT))

    ref_outs, (ref_hT, ref_cT) = _reference_rollout(obs_seq, laser_seq,
                                                    (h0, c0), params)
    assert outs.shape == (T, B, dim_action)
    assert jnp.allclose(outs, ref_outs, atol=3e-2, rtol=3e-2)
    assert jnp.allclose(hT, ref_hT, atol=3e-2, rtol=3e-2)
    assert jnp.allclose(cT, ref_cT, atol=3e-2, rtol=3e-2)

    print("KERNEL_OK")
</pallas_src>

<mosaic_0001>
module attributes {stable_mosaic.version = 11 : i64} {
  func.func @_actor_kernel(%arg0: i32, %arg1: i32, %arg2: memref<1x8x128xbf16, #tpu.memory_space<vmem>>, %arg3: memref<8x256xf32, #tpu.memory_space<vmem>>, %arg4: memref<512x128xbf16, #tpu.memory_space<vmem>>, %arg5: memref<256x512xbf16, #tpu.memory_space<vmem>>, %arg6: memref<1x896xf32, #tpu.memory_space<vmem>>, %arg7: memref<1x8x128xf32, #tpu.memory_space<vmem>>, %arg8: memref<8x256xf32, #tpu.memory_space<vmem>>, %arg9: memref<8x256xf32, #tpu.memory_space<vmem>>) attributes {dimension_semantics = [#tpu.dimension_semantics<parallel>, #tpu.dimension_semantics<arbitrary>], iteration_bounds = array<i64: 1, 1>, scalar_prefetch = 0 : i64, scratch_operands = 1 : i64, tpu.core_type = #tpu.core_type<tc>, window_params = [{transform_indices = @transform_0, window_bounds = array<i64: 1, 8, 128>}, {transform_indices = @transform_1, window_bounds = array<i64: 8, 256>}, {pipeline_mode = #tpu.pipeline_mode<synchronous>, transform_indices = @transform_2, window_bounds = array<i64: 512, 128>}, {pipeline_mode = #tpu.pipeline_mode<synchronous>, transform_indices = @transform_3, window_bounds = array<i64: 256, 512>}, {pipeline_mode = #tpu.pipeline_mode<synchronous>, transform_indices = @transform_4, window_bounds = array<i64: 1, 896>}, {transform_indices = @transform_5, window_bounds = array<i64: 1, 8, 128>}, {transform_indices = @transform_6, window_bounds = array<i64: 8, 256>}]} {
    %c0_i32 = arith.constant 0 : i32
    %0 = arith.cmpi eq, %arg1, %c0_i32 : i32
    %1 = arith.extui %0 : i1 to i32
    %c0_i32_0 = arith.constant 0 : i32
    %2 = arith.cmpi ne, %1, %c0_i32_0 : i32
    scf.if %2 {
      %c0_43 = arith.constant 0 : index
      %c0_44 = arith.constant 0 : index
      %77 = vector.load %arg3[%c0_43, %c0_44] : memref<8x256xf32, #tpu.memory_space<vmem>>, vector<8x256xf32>
      %c0_45 = arith.constant 0 : index
      %c0_46 = arith.constant 0 : index
      %78 = vector.load %arg9[%c0_45, %c0_46] : memref<8x256xf32, #tpu.memory_space<vmem>>, vector<8x256xf32>
      tpu.vector_store %arg9[%c0_45, %c0_46], %77 {strides = array<i32>} : memref<8x256xf32, #tpu.memory_space<vmem>>, vector<8x256xf32>,
    } else {
    }
    %c0 = arith.constant 0 : index
    %c0_1 = arith.constant 0 : index
    %3 = vector.load %arg9[%c0, %c0_1] : memref<8x256xf32, #tpu.memory_space<vmem>>, vector<8x128xf32>
    %c0_2 = arith.constant 0 : index
    %c128 = arith.constant 128 : index
    %4 = vector.load %arg9[%c0_2, %c128] : memref<8x256xf32, #tpu.memory_space<vmem>>, vector<8x128xf32>
    %c0_3 = arith.constant 0 : index
    %c0_4 = arith.constant 0 : index
    %5 = vector.load %arg6[%c0_3, %c0_4] : memref<1x896xf32, #tpu.memory_space<vmem>>, vector<1x128xf32>
    %c0_5 = arith.constant 0 : index
    %c128_6 = arith.constant 128 : index
    %6 = vector.load %arg6[%c0_5, %c128_6] : memref<1x896xf32, #tpu.memory_space<vmem>>, vector<1x128xf32>
    %c0_7 = arith.constant 0 : index
    %c256 = arith.constant 256 : index
    %7 = vector.load %arg6[%c0_7, %c256] : memref<1x896xf32, #tpu.memory_space<vmem>>, vector<1x512xf32>
    %c0_8 = arith.constant 0 : index
    %c768 = arith.constant 768 : index
    %8 = vector.load %arg6[%c0_8, %c768] : memref<1x896xf32, #tpu.memory_space<vmem>>, vector<1x128xf32>
    %c0_9 = arith.constant 0 : index
    %c0_10 = arith.constant 0 : index
    %9 = vector.load %arg4[%c0_9, %c0_10] : memref<512x128xbf16, #tpu.memory_space<vmem>>, vector<128x128xbf16>
    %c128_11 = arith.constant 128 : index
    %c0_12 = arith.constant 0 : index
    %10 = vector.load %arg4[%c128_11, %c0_12] : memref<512x128xbf16, #tpu.memory_space<vmem>>, vector<128x128xbf16>
    %c256_13 = arith.constant 256 : index
    %c0_14 = arith.constant 0 : index
    %11 = vector.load %arg4[%c256_13, %c0_14] : memref<512x128xbf16, #tpu.memory_space<vmem>>, vector<128x128xbf16>
    %c384 = arith.constant 384 : index
    %c0_15 = arith.constant 0 : index
    %12 = vector.load %arg4[%c384, %c0_15] : memref<512x128xbf16, #tpu.memory_space<vmem>>, vector<128x128xbf16>
    %c0_16 = arith.constant 0 : index
    %c0_17 = arith.constant 0 : index
    %13 = vector.load %arg5[%c0_16, %c0_17] : memref<256x512xbf16, #tpu.memory_space<vmem>>, vector<128x512xbf16>
    %c128_18 = arith.constant 128 : index
    %c0_19 = arith.constant 0 : index
    %14 = vector.load %arg5[%c128_18, %c0_19] : memref<256x512xbf16, #tpu.memory_space<vmem>>, vector<128x512xbf16>
    %c0_20 = arith.constant 0 : index
    %c0_21 = arith.constant 0 : index
    %c0_22 = arith.constant 0 : index
    %15 = vector.load %arg2[%c0_20, %c0_21, %c0_22] : memref<1x8x128xbf16, #tpu.memory_space<vmem>>, vector<1x8x128xbf16>
    %16 = vector.shape_cast %15 : vector<1x8x128xbf16> to vector<8x128xbf16>
    %17 = arith.truncf %3 : vector<8x128xf32> to vector<8x128xbf16>
    %cst = arith.constant dense<0.000000e+00> : vector<8x128xf32>
    %18 = tpu.matmul %16, %9, %cst {dimension_numbers = #tpu.dot_dimension_numbers<[1], [0], [0], [1], [0, 0, 1, 1], [], []>} : vector<8x128xbf16>, vector<128x128xbf16>, vector<8x128xf32> -> vector<8x128xf32>
    %19 = vector.broadcast %5 : vector<1x128xf32> to vector<8x128xf32>
    %20 = arith.addf %18, %19 : vector<8x128xf32>
    %cst_23 = arith.constant 0.000000e+00 : f32
    %21 = vector.broadcast %cst_23 : f32 to vector<8x128xf32>
    %22 = arith.maximumf %20, %21 : vector<8x128xf32>
    %cst_24 = arith.constant dense<0.000000e+00> : vector<8x128xf32>
    %23 = tpu.matmul %16, %10, %cst_24 {dimension_numbers = #tpu.dot_dimension_numbers<[1], [0], [0], [1], [0, 0, 1, 1], [], []>} : vector<8x128xbf16>, vector<128x128xbf16>, vector<8x128xf32> -> vector<8x128xf32>
    %24 = arith.truncf %22 : vector<8x128xf32> to vector<8x128xbf16>
    %cst_25 = arith.constant dense<0.000000e+00> : vector<8x128xf32>
    %25 = tpu.matmul %24, %11, %cst_25 {dimension_numbers = #tpu.dot_dimension_numbers<[1], [0], [0], [1], [0, 0, 1, 1], [], []>} : vector<8x128xbf16>, vector<128x128xbf16>, vector<8x128xf32> -> vector<8x128xf32>
    %26 = arith.addf %23, %25 : vector<8x128xf32>
    %27 = vector.broadcast %6 : vector<1x128xf32> to vector<8x128xf32>
    %28 = arith.addf %26, %27 : vector<8x128xf32>
    %cst_26 = arith.constant 0.000000e+00 : f32
    %29 = vector.broadcast %cst_26 : f32 to vector<8x128xf32>
    %30 = arith.maximumf %28, %29 : vector<8x128xf32>
    %31 = arith.truncf %30 : vector<8x128xf32> to vector<8x128xbf16>
    %cst_27 = arith.constant dense<0.000000e+00> : vector<8x512xf32>
    %32 = tpu.matmul %31, %13, %cst_27 {dimension_numbers = #tpu.dot_dimension_numbers<[1], [0], [0], [1], [0, 0, 1, 1], [], []>} : vector<8x128xbf16>, vector<128x512xbf16>, vector<8x512xf32> -> vector<8x512xf32>
    %cst_28 = arith.constant dense<0.000000e+00> : vector<8x512xf32>
    %33 = tpu.matmul %17, %14, %cst_28 {dimension_numbers = #tpu.dot_dimension_numbers<[1], [0], [0], [1], [0, 0, 1, 1], [], []>} : vector<8x128xbf16>, vector<128x512xbf16>, vector<8x512xf32> -> vector<8x512xf32>
    %34 = arith.addf %32, %33 : vector<8x512xf32>
    %35 = vector.broadcast %7 : vector<1x512xf32> to vector<8x512xf32>
    %36 = arith.addf %34, %35 : vector<8x512xf32>
    %37 = vector.extract_strided_slice %36 {offsets = [0, 0], sizes = [8, 128], strides = [1, 1]} : vector<8x512xf32> to vector<8x128xf32>
    %38 = arith.negf %37 : vector<8x128xf32>
    %39 = math.exp %38 : vector<8x128xf32>
    %cst_29 = arith.constant 1.000000e+00 : f32
    %40 = vector.broadcast %cst_29 : f32 to vector<8x128xf32>
    %41 = arith.addf %40, %39 : vector<8x128xf32>
    %42 = arith.divf %40, %41 : vector<8x128xf32>
    %43 = vector.extract_strided_slice %36 {offsets = [0, 128], sizes = [8, 128], strides = [1, 1]} : vector<8x512xf32> to vector<8x128xf32>
    %44 = arith.negf %43 : vector<8x128xf32>
    %45 = math.exp %44 : vector<8x128xf32>
    %cst_30 = arith.constant 1.000000e+00 : f32
    %46 = vector.broadcast %cst_30 : f32 to vector<8x128xf32>
    %47 = arith.addf %46, %45 : vector<8x128xf32>
    %48 = arith.divf %46, %47 : vector<8x128xf32>
    %49 = vector.extract_strided_slice %36 {offsets = [0, 256], sizes = [8, 128], strides = [1, 1]} : vector<8x512xf32> to vector<8x128xf32>
    %50 = math.tanh %49 : vector<8x128xf32>
    %51 = vector.extract_strided_slice %36 {offsets = [0, 384], sizes = [8, 128], strides = [1, 1]} : vector<8x512xf32> to vector<8x128xf32>
    %52 = arith.negf %51 : vector<8x128xf32>
    %53 = math.exp %52 : vector<8x128xf32>
    %cst_31 = arith.constant 1.000000e+00 : f32
    %54 = vector.broadcast %cst_31 : f32 to vector<8x128xf32>
    %55 = arith.addf %54, %53 : vector<8x128xf32>
    %56 = arith.divf %54, %55 : vector<8x128xf32>
    %57 = arith.mulf %48, %4 : vector<8x128xf32>
    %58 = arith.mulf %42, %50 : vector<8x128xf32>
    %59 = arith.addf %57, %58 : vector<8x128xf32>
    %60 = math.tanh %59 : vector<8x128xf32>
    %61 = arith.mulf %56, %60 : vector<8x128xf32>
    %62 = arith.truncf %61 : vector<8x128xf32> to vector<8x128xbf16>
    %cst_32 = arith.constant dense<0.000000e+00> : vector<8x128xf32>
    %63 = tpu.matmul %62, %12, %cst_32 {dimension_numbers = #tpu.dot_dimension_numbers<[1], [0], [0], [1], [0, 0, 1, 1], [], []>} : vector<8x128xbf16>, vector<128x128xbf16>, vector<8x128xf32> -> vector<8x128xf32>
    %64 = vector.broadcast %8 : vector<1x128xf32> to vector<8x128xf32>
    %65 = arith.addf %63, %64 : vector<8x128xf32>
    %66 = math.tanh %65 : vector<8x128xf32>
    %cst_33 = arith.constant 5.000000e-01 : f32
    %67 = vector.broadcast %cst_33 : f32 to vector<8x128xf32>
    %68 = arith.mulf %66, %67 : vector<8x128xf32>
    %c0_34 = arith.constant 0 : index
    %c0_35 = arith.constant 0 : index
    %c0_36 = arith.constant 0 : index
    %69 = vector.load %arg7[%c0_34, %c0_35, %c0_36] : memref<1x8x128xf32, #tpu.memory_space<vmem>>, vector<1x8x128xf32>
    %70 = vector.shape_cast %69 : vector<1x8x128xf32> to vector<8x128xf32>
    %71 = vector.shape_cast %68 : vector<8x128xf32> to vector<1x8x128xf32>
    tpu.vector_store %arg7[%c0_34, %c0_35, %c0_36], %71 {strides = array<i32>} : memref<1x8x128xf32, #tpu.memory_space<vmem>>, vector<1x8x128xf32>,
    %c0_37 = arith.constant 0 : index
    %c0_38 = arith.constant 0 : index
    %72 = vector.load %arg9[%c0_37, %c0_38] : memref<8x256xf32, #tpu.memory_space<vmem>>, vector<8x128xf32>
    tpu.vector_store %arg9[%c0_37, %c0_38], %61 {strides = array<i32>} : memref<8x256xf32, #tpu.memory_space<vmem>>, vector<8x128xf32>,
    %c0_39 = arith.constant 0 : index
    %c128_40 = arith.constant 128 : index
    %73 = vector.load %arg9[%c0_39, %c128_40] : memref<8x256xf32, #tpu.memory_space<vmem>>, vector<8x128xf32>
    tpu.vector_store %arg9[%c0_39, %c128_40], %59 {strides = array<i32>} : memref<8x256xf32, #tpu.memory_space<vmem>>, vector<8x128xf32>,
    %c0_i32_41 = arith.constant 0 : i32
    %74 = arith.cmpi eq, %arg1, %c0_i32_41 : i32
    %75 = arith.extui %74 : i1 to i32
    %c0_i32_42 = arith.constant 0 : i32
    %76 = arith.cmpi ne, %75, %c0_i32_42 : i32
    scf.if %76 {
      %c0_43 = arith.constant 0 : index
      %c0_44 = arith.constant 0 : index
      %77 = vector.load %arg8[%c0_43, %c0_44] : memref<8x256xf32, #tpu.memory_space<vmem>>, vector<8x128xf32>
      tpu.vector_store %arg8[%c0_43, %c0_44], %61 {strides = array<i32>} : memref<8x256xf32, #tpu.memory_space<vmem>>, vector<8x128xf32>,
      %c0_45 = arith.constant 0 : index
      %c128_46 = arith.constant 128 : index
      %78 = vector.load %arg8[%c0_45, %c128_46] : memref<8x256xf32, #tpu.memory_space<vmem>>, vector<8x128xf32>
      tpu.vector_store %arg8[%c0_45, %c128_46], %59 {strides = array<i32>} : memref<8x256xf32, #tpu.memory_space<vmem>>, vector<8x128xf32>,
    } else {
    }
    return
  }
  func.func @transform_0(%arg0: i32, %arg1: i32) -> (i32, i32, i32) {
    %c0_i32 = arith.constant 0 : i32
    %c0_i32_0 = arith.constant 0 : i32
    return %arg1, %arg0, %c0_i32 : i32, i32, i32
  }
  func.func @transform_1(%arg0: i32, %arg1: i32) -> (i32, i32) {
    %c0_i32 = arith.constant 0 : i32
    %c0_i32_0 = arith.constant 0 : i32
    return %arg0, %c0_i32 : i32, i32
  }
  func.func @transform_2(%arg0: i32, %arg1: i32) -> (i32, i32) {
    %c0_i32 = arith.constant 0 : i32
    %c0_i32_0 = arith.constant 0 : i32
    %c0_i32_1 = arith.constant 0 : i32
    return %c0_i32, %c0_i32_0 : i32, i32
  }
  func.func @transform_3(%arg0: i32, %arg1: i32) -> (i32, i32) {
    %c0_i32 = arith.constant 0 : i32
    %c0_i32_0 = arith.constant 0 : i32
    %c0_i32_1 = arith.constant 0 : i32
    return %c0_i32, %c0_i32_0 : i32, i32
  }
  func.func @transform_4(%arg0: i32, %arg1: i32) -> (i32, i32) {
    %c0_i32 = arith.constant 0 : i32
    %c0_i32_0 = arith.constant 0 : i32
    %c0_i32_1 = arith.constant 0 : i32
    return %c0_i32, %c0_i32_0 : i32, i32
  }
  func.func @transform_5(%arg0: i32, %arg1: i32) -> (i32, i32, i32) {
    %c0_i32 = arith.constant 0 : i32
    %c0_i32_0 = arith.constant 0 : i32
    return %arg1, %arg0, %c0_i32 : i32, i32, i32
  }
  func.func @transform_6(%arg0: i32, %arg1: i32) -> (i32, i32) {
    %c0_i32 = arith.constant 0 : i32
    %c0_i32_0 = arith.constant 0 : i32
    return %arg0, %c0_i32 : i32, i32
  }
}

</mosaic_0001>

<bundles_post_ra>
// kernel: tpu_custom_call.1
= control target key start
LH: loop header
LB: loop body
LE: loop exit
PB: predicated region body
PF: predicated region fallthrough
CT: control target
= control target key end

     0   :  { %12 = vsyncpa [#allocation4], 0  ;;  %s1869_s0 = inlined_call_operand.hbm [shape: bf16[1,8,128], index: 0, kind: input, shape index: {}]   ;;  %s1870_s1 = inlined_call_operand.hbm [shape: f32[8,256], index: 1, kind: input, shape index: {}]   ;;  %s1871_s2 = inlined_call_operand.hbm [shape: bf16[512,128], index: 2, kind: input, shape index: {}]   ;;  %s1872_s3 = inlined_call_operand.hbm [shape: bf16[256,512], index: 3, kind: input, shape index: {}]   ;;  %s1873_s4 = inlined_call_operand.vmem [shape: f32[1,896], index: 4, kind: input, shape index: {}]   ;;  %s1874_s5 = inlined_call_operand.hbm [shape: f32[1,8,128], index: 5, kind: output, shape index: {0}]   ;;  %s1875_s6 = inlined_call_operand.hbm [shape: f32[8,256], index: 6, kind: output, shape index: {1}]  }
   0x1   :  { %13 = vsyncpa [#allocation7], 0 }
   0x2   :  { %14 = vsyncpa [#allocation10], 0 }
   0x3   :  { %15 = vsyncpa [#allocation5], 0 }
   0x4   :  { %16 = vsyncpa [#allocation13], 0  ;;  %s1689_s21 = smov [#allocation6]   ;;  %s1690_s23 = smov [#allocation3]  }
   0x5   :  { %s33_s22 = sshll.u32 %s1689_s21, 4  ;;  %s23_s24 = sshll.u32 %s1690_s23, 4  ;;  %s34_s22 = int_to_ptr.vmem [resolvable:$true] %s33_s22  ;;  %s24_s24 = int_to_ptr.vmem [resolvable:$true] %s23_s24 }
   0x6   :  { %s1547_s27 = scalar_lea.hbm %s1870_s1, 256 }
   0x7   :  { %p1548_p0 = scmp.ne.s32.totalorder %s1870_s1, %s1547_s27  ;;  %p1551_p1 = scmp.lt.u32.totalorder %s1547_s27, %s1870_s1 }
   0x9   :  { %p1553_p2 = pnand %p1551_p1, %p1548_p0 }
   0xb   :  { %1556 = shalt.err (!%p1553_p2)
}
   0xc   :  { %s1557_s8 = scalar_lea.vmem %s34_s22, 256  ;;  %p1562_p4 = scmp.lt.s32.totalorder %s34_s22, %s34_s22 }
   0xd   :  { %p1558_p3 = scmp.ne.s32.totalorder %s34_s22, %s1557_s8  ;;  %p1563_p5 = scmp.lt.s32.totalorder %s1557_s8, %s1557_s8 }
   0xf   :  { %p1564_p6 = por %p1563_p5, %p1562_p4 }
  0x11   :  { %p1565_p7 = pnand %p1564_p6, %p1558_p3 }
  0x13   :  { %1568 = shalt.err (!%p1565_p7)
}
  0x14   :  { %36 = dma.hbm_to_vmem [thread:$0]  %s1870_s1, 256, %s34_s22, [#allocation7]  }
  0x15   :  { %s1569_s13 = scalar_lea.hbm %s1869_s0, 64 }
  0x16   :  { %p1570_p8 = scmp.ne.s32.totalorder %s1869_s0, %s1569_s13  ;;  %p1573_p9 = scmp.lt.u32.totalorder %s1569_s13, %s1869_s0 }
  0x18   :  { %p1575_p10 = pnand %p1573_p9, %p1570_p8 }
  0x1a   :  { %1578 = shalt.err (!%p1575_p10)
}
  0x1b   :  { %s1579_s18 = scalar_lea.vmem %s24_s24, 64  ;;  %p1584_p12 = scmp.lt.s32.totalorder %s24_s24, %s24_s24 }
  0x1c   :  { %p1580_p11 = scmp.ne.s32.totalorder %s24_s24, %s1579_s18  ;;  %p1585_p13 = scmp.lt.s32.totalorder %s1579_s18, %s1579_s18 }
  0x1e   :  { %p1586_p0 = por %p1585_p13, %p1584_p12 }
  0x20   :  { %p1587_p1 = pnand %p1586_p0, %p1580_p11 }
  0x22   :  { %1590 = shalt.err (!%p1587_p1)
}
  0x23   :  { %26 = dma.hbm_to_vmem [thread:$0]  %s1869_s0, 64, %s24_s24, [#allocation4]  }
  0x24   :  { %s1691_s20 = smov [#allocation8]   ;;  %s1591_s25 = scalar_lea.hbm %s1871_s2, 4096 }
  0x25   :  { %s42_s21 = sshll.u32 %s1691_s20, 4  ;;  %p1592_p2 = scmp.ne.s32.totalorder %s1871_s2, %s1591_s25  ;;  %s43_s21 = int_to_ptr.vmem [resolvable:$true] %s42_s21 }
  0x26   :  { %p1595_p3 = scmp.lt.u32.totalorder %s1591_s25, %s1871_s2 }
  0x28   :  { %p1597_p4 = pnand %p1595_p3, %p1592_p2 }
  0x2a   :  { %1600 = shalt.err (!%p1597_p4)
}
  0x2b   :  { %s1601_s30 = scalar_lea.vmem %s43_s21, 4096  ;;  %p1606_p6 = scmp.lt.s32.totalorder %s43_s21, %s43_s21 }
  0x2c   :  { %p1602_p5 = scmp.ne.s32.totalorder %s43_s21, %s1601_s30  ;;  %p1607_p7 = scmp.lt.s32.totalorder %s1601_s30, %s1601_s30 }
  0x2e   :  { %p1608_p8 = por %p1607_p7, %p1606_p6 }
  0x30   :  { %p1609_p9 = pnand %p1608_p8, %p1602_p5 }
  0x32   :  { %1612 = shalt.err (!%p1609_p9)
}
  0x33   :  { %s1692_s0 = smov 64   ;;  %s1693_s24 = smov 4  }
  0x34   :  { %48 = dma.hbm_to_vmem [thread:$0]  %s1871_s2, 4096, %s43_s21, [#allocation7], %s1692_s0, %s1692_s0, %s1693_s24  }
  0x35   :  { %s1694_s9 = smov [#allocation9]   ;;  %s1613_s13 = scalar_lea.hbm %s1872_s3, 8192 }
  0x36   :  { %s54_s10 = sshll.u32 %s1694_s9, 4  ;;  %p1614_p10 = scmp.ne.s32.totalorder %s1872_s3, %s1613_s13  ;;  %s55_s10 = int_to_ptr.vmem [resolvable:$true] %s54_s10 }
  0x37   :  { %p1617_p11 = scmp.lt.u32.totalorder %s1613_s13, %s1872_s3 }
  0x39   :  { %p1619_p12 = pnand %p1617_p11, %p1614_p10 }
  0x3b   :  { %1622 = shalt.err (!%p1619_p12)
}
  0x3c   :  { %s1623_s18 = scalar_lea.vmem %s55_s10, 8192  ;;  %p1628_p0 = scmp.lt.s32.totalorder %s55_s10, %s55_s10 }
  0x3d   :  { %p1624_p13 = scmp.ne.s32.totalorder %s55_s10, %s1623_s18  ;;  %p1629_p1 = scmp.lt.s32.totalorder %s1623_s18, %s1623_s18 }
  0x3f   :  { %p1630_p2 = por %p1629_p1, %p1628_p0 }
  0x41   :  { %p1631_p3 = pnand %p1630_p2, %p1624_p13 }
  0x43   :  { %1634 = shalt.err (!%p1631_p3)
}
  0x44   :  { %s1695_s2 = smov 256   ;;  %s1696_s1 = smov 16  }
  0x45   :  { %60 = dma.hbm_to_vmem [thread:$0]  %s1872_s3, 8192, %s55_s10, [#allocation10], %s1695_s2, %s1695_s2, %s1696_s1  }
  0x46   :  { %1679 = dma.done.wait [#allocation4], 64  }
  0x47   :  { %1680 = vsyncadd [#allocation4], 4294967232 }
  0x48   :  { %1681 = dma.done.wait [#allocation7], 4352  }
  0x49   :  { %1682 = vsyncadd [#allocation7], 4294962944 }
  0x4a   :  { %1683 = dma.done.wait [#allocation10], 8192  }
  0x4b   :  { %1684 = vsyncadd [#allocation10], 4294959104  ;;  %v1697_v0 = vmov 0.0   ;;  %vm1698_vm0 = vmmov 0   ;;  %v1401_v1 = vld [vmem:[#allocation8] sm:$0xff]   ;;  %v1402_v2 = vld [vmem:[#allocation8 + $0x8] sm:$0xff]  }
  0x4c   :  { %1308 = vmatprep.subr.bf16.mxu0 %v1697_v0  ;;  %1324 = vmatprep.mubr.msk.bf16.mxu0 %vm1698_vm0, %v1697_v0  ;;  %v1403_v3 = vld [vmem:[#allocation8 + $0x10] sm:$0xff]   ;;  %v1404_v4 = vld [vmem:[#allocation8 + $0x18] sm:$0xff]   ;;  %v1410_v5 = vld [vmem:[#allocation8 + $0x80] sm:$0xff]   ;;  %v1699_v44 = vmov 0   ;;  %s1700_s27 = smov [#allocation12]  }
  0x4d   :  { %1328 = vmatprep.subr.bf16.mxu1 %v1697_v0  ;;  %1344 = vmatprep.mubr.msk.bf16.mxu1 %vm1698_vm0, %v1697_v0  ;;  %v1412_v6 = vld [vmem:[#allocation8 + $0x88] sm:$0xff]   ;;  %v1405_v7 = vld [vmem:[#allocation8 + $0x20] sm:$0xff]   ;;  %v1414_v8 = vld [vmem:[#allocation8 + $0x90] sm:$0xff]   ;;  %s1155_s28 = sshll.u32 %s1700_s27, 4  ;;  %s1156_s28 = int_to_ptr.vmem [resolvable:$true] %s1155_s28 }
  0x4e   :  { %1309 = vmatpush3.bf16.msra.mxu0 %v1401_v1  ;;  %1329 = vmatpush3.bf16.msra.mxu1 %v1410_v5  ;;  %v1406_v9 = vld [vmem:[#allocation8 + $0x28] sm:$0xff]   ;;  %v1416_v10 = vld [vmem:[#allocation8 + $0x98] sm:$0xff]   ;;  %v1407_v11 = vld [vmem:[#allocation8 + $0x30] sm:$0xff]   ;;  %s1635_s29 = scalar_lea.vmem %s1156_s28, 256  ;;  %p1640_p5 = scmp.lt.s32.totalorder %s1156_s28, %s1156_s28 }
  0x4f   :  { %1310 = vmatprep.subr.bf16.mxu0 %v1697_v0  ;;  %1330 = vmatprep.subr.bf16.mxu1 %v1697_v0  ;;  %v1418_v12 = vld [vmem:[#allocation8 + $0xa0] sm:$0xff]   ;;  %v1408_v13 = vld [vmem:[#allocation8 + $0x38] sm:$0xff]   ;;  %v1420_v14 = vld [vmem:[#allocation8 + $0xa8] sm:$0xff]   ;;  %p1636_p4 = scmp.ne.s32.totalorder %s1156_s28, %s1635_s29  ;;  %p1641_p6 = scmp.lt.s32.totalorder %s1635_s29, %s1635_s29 }
  0x50   :  { %v218_v15 = vld [vmem:[#allocation3] sm:$0xf]  ;;  %v1409_v16 = vld [vmem:[#allocation8 + $0x40] sm:$0xff]   ;;  %v1413_v18 = vld [vmem:[#allocation8 + $0x50] sm:$0xff]  }
  0x51   :  { %v1411_v17 = vld [vmem:[#allocation8 + $0x48] sm:$0xff]   ;;  %v1415_v19 = vld [vmem:[#allocation8 + $0x58] sm:$0xff]   ;;  %v1417_v20 = vld [vmem:[#allocation8 + $0x60] sm:$0xff]   ;;  %p1642_p7 = por %p1641_p6, %p1640_p5 }
  0x52   :  { %1311 = vmatpush3.bf16.msra.mxu0 %v1402_v2  ;;  %1331 = vmatpush3.bf16.msra.mxu1 %v1412_v6  ;;  %v1419_v21 = vld [vmem:[#allocation8 + $0x68] sm:$0xff]   ;;  %v1421_v22 = vld [vmem:[#allocation8 + $0x70] sm:$0xff]   ;;  %v1423_v24 = vld [vmem:[#allocation8 + $0x78] sm:$0xff]  }
  0x53   :  { %1312 = vmatprep.subr.bf16.mxu0 %v1697_v0  ;;  %1332 = vmatprep.subr.bf16.mxu1 %v1697_v0  ;;  %v1422_v23 = vld [vmem:[#allocation8 + $0xb0] sm:$0xff]   ;;  %v1424_v25 = vld [vmem:[#allocation8 + $0xb8] sm:$0xff]   ;;  %v1170_v58 = vld [vmem:[%s1873_s4] ss:$0 sm:$0xff]  ;;  %p1643_p8 = pnand %p1642_p7, %p1636_p4 }
  0x54   :  { %v1427_v26 = vld [vmem:[#allocation9 + $0x104] ss:$16 sps:$4 sm:$0xff]   ;;  %v1428_v27 = vld [vmem:[#allocation9 + $0x108] ss:$16 sps:$4 sm:$0xff]   ;;  %v1430_v28 = vld [vmem:[#allocation9 + $0x10c] ss:$16 sps:$4 sm:$0xff]  }
  0x55   :  { %v1434_v29 = vld [vmem:[#allocation9 + $0x128] ss:$16 sps:$4 sm:$0xff]   ;;  %v1436_v30 = vld [vmem:[#allocation9 + $0x12c] ss:$16 sps:$4 sm:$0xff]   ;;  %v80_v43 = vld [vmem:[#allocation6] sm:$0xff] }
  0x56   :  { %1313 = vmatpush3.bf16.msra.mxu0 %v1403_v3  ;;  %1333 = vmatpush3.bf16.msra.mxu1 %v1414_v8  ;;  %v1440_v31 = vld [vmem:[#allocation9 + $0x148] ss:$16 sps:$4 sm:$0xff]   ;;  %v1442_v32 = vld [vmem:[#allocation9 + $0x14c] ss:$16 sps:$4 sm:$0xff]   ;;  %v1816_v46 = vpack.c.bf16 %v80_v43, %v80_v43  ;;  %v1425_v2 = vld [vmem:[#allocation9 + $0x100] ss:$16 sps:$4 sm:$0xff]  }
  0x57   :  { %1314 = vmatprep.subr.bf16.mxu0 %v1697_v0  ;;  %1334 = vmatprep.subr.bf16.mxu1 %v1697_v0  ;;  %v1446_v33 = vld [vmem:[#allocation9 + $0x168] ss:$16 sps:$4 sm:$0xff]   ;;  %v1448_v34 = vld [vmem:[#allocation9 + $0x16c] ss:$16 sps:$4 sm:$0xff]   ;;  %v1431_v5 = vld [vmem:[#allocation9 + $0x120] ss:$16 sps:$4 sm:$0xff]  }
  0x58   :  { %v1452_v35 = vld [vmem:[#allocation9 + $0x188] ss:$16 sps:$4 sm:$0xff]   ;;  %v1454_v36 = vld [vmem:[#allocation9 + $0x18c] ss:$16 sps:$4 sm:$0xff]   ;;  %v1439_v6 = vld [vmem:[#allocation9 + $0x144] ss:$16 sps:$4 sm:$0xff]  }
  0x59   :  { %v1458_v37 = vld [vmem:[#allocation9 + $0x1a8] ss:$16 sps:$4 sm:$0xff]   ;;  %v1460_v38 = vld [vmem:[#allocation9 + $0x1ac] ss:$16 sps:$4 sm:$0xff]   ;;  %v1445_v8 = vld [vmem:[#allocation9 + $0x164] ss:$16 sps:$4 sm:$0xff]  }
  0x5a   :  { %1315 = vmatpush3.bf16.msra.mxu0 %v1404_v4  ;;  %1335 = vmatpush3.bf16.msra.mxu1 %v1416_v10  ;;  %v1464_v39 = vld [vmem:[#allocation9 + $0x1c8] ss:$16 sps:$4 sm:$0xff]   ;;  %v1466_v40 = vld [vmem:[#allocation9 + $0x1cc] ss:$16 sps:$4 sm:$0xff]   ;;  %v1433_v4 = vld [vmem:[#allocation9 + $0x124] ss:$16 sps:$4 sm:$0xff]  }
  0x5b   :  { %1316 = vmatprep.subr.bf16.mxu0 %v1697_v0  ;;  %1336 = vmatprep.subr.bf16.mxu1 %v1697_v0  ;;  %v1470_v41 = vld [vmem:[#allocation9 + $0x1e8] ss:$16 sps:$4 sm:$0xff]   ;;  %v1472_v42 = vld [vmem:[#allocation9 + $0x1ec] ss:$16 sps:$4 sm:$0xff]   ;;  %v1451_v10 = vld [vmem:[#allocation9 + $0x184] ss:$16 sps:$4 sm:$0xff]  }
  0x5c   :  { %v1476_v45 = vld [vmem:[#allocation9 + $0x8] ss:$16 sps:$4 sm:$0xff]   ;;  %v1478_v47 = vld [vmem:[#allocation9 + $0xc] ss:$16 sps:$4 sm:$0xff]  }
  0x5d   :  { %v1484_v48 = vld [vmem:[#allocation9 + $0x2c] ss:$16 sps:$4 sm:$0xff]   ;;  %v1482_v49 = vld [vmem:[#allocation9 + $0x28] ss:$16 sps:$4 sm:$0xff]  }
  0x5e   :  { %1317 = vmatpush3.bf16.msra.mxu0 %v1405_v7  ;;  %1337 = vmatpush3.bf16.msra.mxu1 %v1418_v12  ;;  %v1490_v50 = vld [vmem:[#allocation9 + $0x4c] ss:$16 sps:$4 sm:$0xff]   ;;  %v1488_v51 = vld [vmem:[#allocation9 + $0x48] ss:$16 sps:$4 sm:$0xff]   ;;  %v1437_v7 = vld [vmem:[#allocation9 + $0x140] ss:$16 sps:$4 sm:$0xff]  }
  0x5f   :  { %1318 = vmatprep.subr.bf16.mxu0 %v1697_v0  ;;  %1338 = vmatprep.subr.bf16.mxu1 %v1697_v0  ;;  %v1496_v52 = vld [vmem:[#allocation9 + $0x6c] ss:$16 sps:$4 sm:$0xff]   ;;  %v1494_v53 = vld [vmem:[#allocation9 + $0x68] ss:$16 sps:$4 sm:$0xff]   ;;  %v1457_v12 = vld [vmem:[#allocation9 + $0x1a4] ss:$16 sps:$4 sm:$0xff]  }
  0x60   :  { %v1502_v54 = vld [vmem:[#allocation9 + $0x8c] ss:$16 sps:$4 sm:$0xff]   ;;  %v1500_v55 = vld [vmem:[#allocation9 + $0x88] ss:$16 sps:$4 sm:$0xff]  }
  0x61   :  { %v1506_v56 = vld [vmem:[#allocation9 + $0xa8] ss:$16 sps:$4 sm:$0xff]   ;;  %v1508_v57 = vld [vmem:[#allocation9 + $0xac] ss:$16 sps:$4 sm:$0xff]  }
  0x62   :  { %1319 = vmatpush3.bf16.msra.mxu0 %v1406_v9  ;;  %1339 = vmatpush3.bf16.msra.mxu1 %v1420_v14  ;;  %v1443_v9 = vld [vmem:[#allocation9 + $0x160] ss:$16 sps:$4 sm:$0xff]   ;;  %v1463_v14 = vld [vmem:[#allocation9 + $0x1c4] ss:$16 sps:$4 sm:$0xff]  }
  0x63   :  { %1320 = vmatprep.subr.bf16.mxu0 %v1697_v0  ;;  %1340 = vmatprep.subr.bf16.mxu1 %v1697_v0 }
  0x66   :  { %1321 = vmatpush3.bf16.msra.mxu0 %v1407_v11  ;;  %1341 = vmatpush3.bf16.msra.mxu1 %v1422_v23  ;;  %v1449_v11 = vld [vmem:[#allocation9 + $0x180] ss:$16 sps:$4 sm:$0xff]  }
  0x67   :  { %1322 = vmatprep.subr.bf16.mxu0 %v1697_v0  ;;  %1342 = vmatprep.subr.bf16.mxu1 %v1697_v0  ;;  %v1485_v23 = vld [vmem:[#allocation9 + $0x40] ss:$16 sps:$4 sm:$0xff]  }
  0x6a   :  { %1323 = vmatpush3.bf16.msra.mxu0 %v1408_v13  ;;  %1343 = vmatpush3.bf16.msra.mxu1 %v1424_v25  ;;  %v1455_v13 = vld [vmem:[#allocation9 + $0x1a0] ss:$16 sps:$4 sm:$0xff]  }
  0x6b   :  { %1348 = vmatprep.subr.bf16.mxu0 %v1697_v0  ;;  %661 = vmatprep.subr.bf16.mxu1 %v1427_v26  ;;  %v1491_v25 = vld [vmem:[#allocation9 + $0x60] ss:$16 sps:$4 sm:$0xff]   ;;  %v1499_v26 = vld [vmem:[#allocation9 + $0x84] ss:$16 sps:$4 sm:$0xff]  }
  0x6d   :  { %1325 = vmatmul.mubr.bf16.vlgmr.msra.gmra.mrb[0].mxu0 %v218_v15 }
  0x6e   :  { %1349 = vmatpush3.bf16.msra.mxu0 %v1409_v16  ;;  %1364 = vmatprep.mubr.msk.bf16.mxu0 %vm1698_vm0, %v1697_v0  ;;  %v1469_v16 = vld [vmem:[#allocation9 + $0x1e4] ss:$16 sps:$4 sm:$0xff]  }
  0x6f   :  { %1350 = vmatprep.subr.bf16.mxu0 %v1697_v0 }
  0x72   :  { %1351 = vmatpush3.bf16.msra.mxu0 %v1411_v17  ;;  %v1467_v17 = vld [vmem:[#allocation9 + $0x1e0] ss:$16 sps:$4 sm:$0xff]  }
  0x73   :  { %1352 = vmatprep.subr.bf16.mxu0 %v1697_v0 }
  0x76   :  { %1353 = vmatpush3.bf16.msra.mxu0 %v1413_v18  ;;  %v1475_v18 = vld [vmem:[#allocation9 + $0x4] ss:$16 sps:$4 sm:$0xff]  }
  0x77   :  { %1354 = vmatprep.subr.bf16.mxu0 %v1697_v0 }
  0x7a   :  { %1355 = vmatpush3.bf16.msra.mxu0 %v1415_v19  ;;  %v1473_v19 = vld [vmem:[#allocation9] ss:$16 sps:$4 sm:$0xff]  }
  0x7b   :  { %1356 = vmatprep.subr.bf16.mxu0 %v1697_v0 }
  0x7e   :  { %1357 = vmatpush3.bf16.msra.mxu0 %v1417_v20  ;;  %v1481_v20 = vld [vmem:[#allocation9 + $0x24] ss:$16 sps:$4 sm:$0xff]  }
  0x7f   :  { %1358 = vmatprep.subr.bf16.mxu0 %v1697_v0 }
  0x82   :  { %1359 = vmatpush3.bf16.msra.mxu0 %v1419_v21  ;;  %v1479_v21 = vld [vmem:[#allocation9 + $0x20] ss:$16 sps:$4 sm:$0xff]  }
  0x83   :  { %1360 = vmatprep.subr.bf16.mxu0 %v1697_v0 }
  0x86   :  { %1361 = vmatpush3.bf16.msra.mxu0 %v1421_v22  ;;  %v1487_v22 = vld [vmem:[#allocation9 + $0x44] ss:$16 sps:$4 sm:$0xff]  }
  0x87   :  { %1362 = vmatprep.subr.bf16.mxu0 %v1697_v0 }
  0x8a   :  { %1363 = vmatpush3.bf16.msra.mxu0 %v1423_v24  ;;  %v1493_v24 = vld [vmem:[#allocation9 + $0x64] ss:$16 sps:$4 sm:$0xff]  }
  0x8b   :  { %702 = vmatprep.subr.bf16.mxu0 %v1430_v28  ;;  %v1505_v28 = vld [vmem:[#allocation9 + $0xa4] ss:$16 sps:$4 sm:$0xff]  }
  0x8d   :  { %1365 = vmatmul.mubr.bf16.vlgmr.msra.gmra.mrb[4].mxu0 %v218_v15  ;;  %v1461_v15 = vld [vmem:[#allocation9 + $0x1c0] ss:$16 sps:$4 sm:$0xff]  }
  0x8e   :  { %703 = vmatpush1.bf16.msra.mxu0 %v1428_v27  ;;  %734 = vmatprep.mubr.bf16.mxu0 %v1699_v44  ;;  %v1497_v27 = vld [vmem:[#allocation9 + $0x80] ss:$16 sps:$4 sm:$0xff]  }
  0x8f   :  { %704 = vmatprep.subr.bf16.mxu0 %v1436_v30 }
  0x92   :  { %705 = vmatpush1.bf16.msra.mxu0 %v1434_v29  ;;  %v1503_v29 = vld [vmem:[#allocation9 + $0xa0] ss:$16 sps:$4 sm:$0xff]  }
  0x93   :  { %706 = vmatprep.subr.bf16.mxu0 %v1442_v32 }
  0x96   :  { %707 = vmatpush1.bf16.msra.mxu0 %v1440_v31 }
  0x97   :  { %708 = vmatprep.subr.bf16.mxu0 %v1448_v34  ;;  %v1514_v34 = vld [vmem:[#allocation9 + $0xcc] ss:$16 sps:$4 sm:$0xff]  }
  0x9a   :  { %709 = vmatpush1.bf16.msra.mxu0 %v1446_v33  ;;  %v1511_v33 = vld [vmem:[#allocation9 + $0xc4] ss:$16 sps:$4 sm:$0xff]  }
  0x9b   :  { %710 = vmatprep.subr.bf16.mxu0 %v1454_v36  ;;  %v1509_v36 = vld [vmem:[#allocation9 + $0xc0] ss:$16 sps:$4 sm:$0xff]  }
  0x9e   :  { %711 = vmatpush1.bf16.msra.mxu0 %v1452_v35 }
  0x9f   :  { %712 = vmatprep.subr.bf16.mxu0 %v1460_v38  ;;  %v1517_v38 = vld [vmem:[#allocation9 + $0xe4] ss:$16 sps:$4 sm:$0xff]  }
  0xa2   :  { %713 = vmatpush1.bf16.msra.mxu0 %v1458_v37  ;;  %v1512_v37 = vld [vmem:[#allocation9 + $0xc8] ss:$16 sps:$4 sm:$0xff]  }
  0xa3   :  { %714 = vmatprep.subr.bf16.mxu0 %v1466_v40  ;;  %v1515_v40 = vld [vmem:[#allocation9 + $0xe0] ss:$16 sps:$4 sm:$0xff]  }
  0xa6   :  { %715 = vmatpush1.bf16.msra.mxu0 %v1464_v39  ;;  %v1520_v39 = vld [vmem:[#allocation9 + $0xec] ss:$16 sps:$4 sm:$0xff]  }
  0xa7   :  { %716 = vmatprep.subr.bf16.mxu0 %v1472_v42 }
  0xaa   :  { %717 = vmatpush1.bf16.msra.mxu0 %v1470_v41  ;;  %v1518_v41 = vld [vmem:[#allocation9 + $0xe8] ss:$16 sps:$4 sm:$0xff]  }
  0xab   :  { %944 = vmatprep.subr.bf16.mxu0 %v1478_v47 }
  0xad   :  { %735 = vmatmul.mubr.bf16.vlgmr.msra.gmra.mrb[8].mxu0 %v1816_v46 }
  0xae   :  { %945 = vmatpush1.bf16.msra.mxu0 %v1476_v45  ;;  %976 = vmatprep.mubr.bf16.mxu0 %v1699_v44 }
  0xaf   :  { %946 = vmatprep.subr.bf16.mxu0 %v1484_v48 }
  0xb2   :  { %947 = vmatpush1.bf16.msra.mxu0 %v1482_v49 }
  0xb3   :  { %948 = vmatprep.subr.bf16.mxu0 %v1490_v50 }
  0xb6   :  { %949 = vmatpush1.bf16.msra.mxu0 %v1488_v51 }
  0xb7   :  { %950 = vmatprep.subr.bf16.mxu0 %v1496_v52 }
  0xba   :  { %951 = vmatpush1.bf16.msra.mxu0 %v1494_v53 }
  0xbb   :  { %952 = vmatprep.subr.bf16.mxu0 %v1502_v54 }
  0xbe   :  { %953 = vmatpush1.bf16.msra.mxu0 %v1500_v55 }
  0xbf   :  { %954 = vmatprep.subr.bf16.mxu0 %v1508_v57 }
  0xc2   :  { %955 = vmatpush1.bf16.msra.mxu0 %v1506_v56 }
  0xc3   :  { %956 = vmatprep.subr.bf16.mxu0 %v1514_v34 }
  0xc6   :  { %957 = vmatpush1.bf16.msra.mxu0 %v1512_v37 }
  0xc7   :  { %958 = vmatprep.subr.bf16.mxu0 %v1520_v39  ;;  %v81_v39 = vld [vmem:[#allocation6 + $0x8] sm:$0xff] }
  0xca   :  { %959 = vmatpush1.bf16.msra.mxu0 %v1518_v41 }
 0x140   :  { %v308_v59 = vpop.f32.mrb[0].mxu0 }
 0x141   :  { %v309_v60 = vadd.f32 %v1170_v58, %v308_v59  ;;  %v1326_v61 = vpop.f32.mrb[1].mxu0  ;;  %v1521_v59 = vld [vmem:[#allocation8 + $0xc0] sm:$0xff]  }
 0x142   :  { %v311_v62 = vpop.f32.mrb[2].mxu0  ;;  %v1523_v61 = vld [vmem:[#allocation8 + $0xd0] sm:$0xff]  }
 0x143   :  { %v314_v63 = vmax.f32 %v309_v60, 0.0  ;;  %v1327_v1 = vpop.f32.mrb[3].mxu0  ;;  %v1522_v60 = vld [vmem:[#allocation8 + $0xc8] sm:$0xff]   ;;  %v1524_v62 = vld [vmem:[#allocation8 + $0xd8] sm:$0xff]  }
 0x144   :  { %v1526_v1 = vld [vmem:[#allocation8 + $0xe8] sm:$0xff]  }
 0x145   :  { %v315_v3 = vpack.c.bf16 %v314_v63, %v314_v63  ;;  %v1525_v63 = vld [vmem:[#allocation8 + $0xe0] sm:$0xff]  }
 0x147   :  { %1345 = vmatmul.mubr.bf16.vlgmr.msra.gmra.mrb[0].mxu1 %v315_v3  ;;  %v1528_v3 = vld [vmem:[#allocation8 + $0xf8] sm:$0xff]  }
 0x148   :  { %662 = vmatpush1.bf16.msra.mxu1 %v1425_v2  ;;  %693 = vmatprep.mubr.bf16.mxu1 %v1699_v44  ;;  %v1527_v2 = vld [vmem:[#allocation8 + $0xf0] sm:$0xff]  }
 0x149   :  { %663 = vmatprep.subr.bf16.mxu1 %v1433_v4  ;;  %v986_v4 = vlaneseq }
 0x14c   :  { %664 = vmatpush1.bf16.msra.mxu1 %v1431_v5  ;;  %v987_v5 = vshrl.u32 %v986_v4, 7 }
 0x14d   :  { %665 = vmatprep.subr.bf16.mxu1 %v1439_v6 }
 0x14e   :  { %v988_v6 = vsub.s32 0, %v987_v5 }
 0x150   :  { %666 = vmatpush1.bf16.msra.mxu1 %v1437_v7  ;;  %v88_v7 = vld [vmem:[%s1873_s4 + $0x2] sm:$0xf] }
 0x151   :  { %667 = vmatprep.subr.bf16.mxu1 %v1445_v8  ;;  %v992_v8 = vsub.s32 1, %v987_v5 }
 0x154   :  { %668 = vmatpush1.bf16.msra.mxu1 %v1443_v9  ;;  %v989_v9 = vrot.slane %v88_v7, %v988_v6 }
 0x155   :  { %669 = vmatprep.subr.bf16.mxu1 %v1451_v10 }
 0x158   :  { %670 = vmatpush1.bf16.msra.mxu1 %v1449_v11 }
 0x159   :  { %671 = vmatprep.subr.bf16.mxu1 %v1457_v12  ;;  %v993_v12 = vrot.slane %v88_v7, %v992_v8 }
 0x15c   :  { %672 = vmatpush1.bf16.msra.mxu1 %v1455_v13 }
 0x15d   :  { %673 = vmatprep.subr.bf16.mxu1 %v1463_v14 }
 0x160   :  { %674 = vmatpush1.bf16.msra.mxu1 %v1461_v15  ;;  %v486_v30 = vpop.f32.mrb[4].mxu0 }
 0x161   :  { %675 = vmatprep.subr.bf16.mxu1 %v1469_v16  ;;  %v1366_v31 = vpop.f32.mrb[5].mxu0 }
 0x162   :  { %v489_v32 = vpop.f32.mrb[6].mxu0 }
 0x163   :  { %v1367_v35 = vpop.f32.mrb[7].mxu0 }
 0x164   :  { %676 = vmatpush1.bf16.msra.mxu1 %v1467_v17 }
 0x165   :  { %903 = vmatprep.subr.bf16.mxu1 %v1475_v18 }
 0x167   :  { %694 = vmatmul.mubr.bf16.vlgmr.msra.gmra.mrb[4].mxu1 %v1816_v46  ;;  %v1195_v46 = vld [vmem:[%s1873_s4 + $0x1] ss:$0 sm:$0xff] }
 0x168   :  { %904 = vmatpush1.bf16.msra.mxu1 %v1473_v19  ;;  %935 = vmatprep.mubr.bf16.mxu1 %v1699_v44 }
 0x169   :  { %905 = vmatprep.subr.bf16.mxu1 %v1481_v20 }
 0x16c   :  { %906 = vmatpush1.bf16.msra.mxu1 %v1479_v21 }
 0x16d   :  { %907 = vmatprep.subr.bf16.mxu1 %v1487_v22 }
 0x170   :  { %908 = vmatpush1.bf16.msra.mxu1 %v1485_v23 }
 0x171   :  { %909 = vmatprep.subr.bf16.mxu1 %v1493_v24 }
 0x174   :  { %910 = vmatpush1.bf16.msra.mxu1 %v1491_v25 }
 0x175   :  { %911 = vmatprep.subr.bf16.mxu1 %v1499_v26 }
 0x178   :  { %912 = vmatpush1.bf16.msra.mxu1 %v1497_v27 }
 0x179   :  { %913 = vmatprep.subr.bf16.mxu1 %v1505_v28  ;;  %v996_v28 = vsub.s32 2, %v987_v5 }
 0x17c   :  { %914 = vmatpush1.bf16.msra.mxu1 %v1503_v29 }
 0x17d   :  { %915 = vmatprep.subr.bf16.mxu1 %v1511_v33 }
 0x180   :  { %916 = vmatpush1.bf16.msra.mxu1 %v1509_v36  ;;  %v736_v42 = vpop.f32.mrb[8].mxu0 }
 0x181   :  { %917 = vmatprep.subr.bf16.mxu1 %v1517_v38  ;;  %v738_v43 = vpop.f32.mrb[9].mxu0 }
 0x182   :  { %v740_v44 = vpop.f32.mrb[10].mxu0 }
 0x183   :  { %v741_v45 = vpop.f32.mrb[11].mxu0 }
 0x184   :  { %918 = vmatpush1.bf16.msra.mxu1 %v1515_v40 }
 0x185   :  { %1368 = vmatprep.subr.bf16.mxu1 %v1697_v0 }
 0x21a   :  { %v398_v47 = vpop.f32.mrb[0].mxu1 }
 0x21b   :  { %v487_v48 = vadd.f32 %v486_v30, %v398_v47  ;;  %v1346_v49 = vpop.f32.mrb[1].mxu1  ;;  %v997_v30 = vrot.slane %v88_v7, %v996_v28 }
 0x21c   :  { %v401_v50 = vpop.f32.mrb[2].mxu1 }
 0x21d   :  { %v498_v51 = vadd.f32 %v1195_v46, %v487_v48  ;;  %v1347_v52 = vpop.f32.mrb[3].mxu1 }
 0x21f   :  { %v499_v53 = vmax.f32 %v498_v51, 0.0 }
 0x221   :  { %v500_v54 = vpack.c.bf16 %v499_v53, %v499_v53 }
 0x223   :  { %936 = vmatmul.mubr.bf16.vlgmr.msra.gmra.mrb[8].mxu1 %v500_v54  ;;  %977 = vmatmul.mubr.bf16.vlgmr.msra.gmra.mrb[12].mxu0 %v500_v54 }
 0x224   :  { %1384 = vmatprep.mubr.msk.bf16.mxu1 %vm1698_vm0, %v1697_v0  ;;  %1369 = vmatpush3.bf16.msra.mxu1 %v1521_v59 }
 0x225   :  { %1370 = vmatprep.subr.bf16.mxu1 %v1697_v0 }
 0x228   :  { %1371 = vmatpush3.bf16.msra.mxu1 %v1522_v60 }
 0x229   :  { %1372 = vmatprep.subr.bf16.mxu1 %v1697_v0 }
 0x22c   :  { %1373 = vmatpush3.bf16.msra.mxu1 %v1523_v61 }
 0x22d   :  { %1374 = vmatprep.subr.bf16.mxu1 %v1697_v0 }
 0x230   :  { %1375 = vmatpush3.bf16.msra.mxu1 %v1524_v62 }
 0x231   :  { %1376 = vmatprep.subr.bf16.mxu1 %v1697_v0 }
 0x234   :  { %1377 = vmatpush3.bf16.msra.mxu1 %v1525_v63 }
 0x235   :  { %1378 = vmatprep.subr.bf16.mxu1 %v1697_v0 }
 0x238   :  { %1379 = vmatpush3.bf16.msra.mxu1 %v1526_v1 }
 0x239   :  { %1380 = vmatprep.subr.bf16.mxu1 %v1697_v0 }
 0x23a   :  { %v695_v55 = vpop.f32.mrb[4].mxu1 }
 0x23b   :  { %v697_v56 = vpop.f32.mrb[5].mxu1 }
 0x23c   :  { %v699_v57 = vpop.f32.mrb[6].mxu1  ;;  %1381 = vmatpush3.bf16.msra.mxu1 %v1527_v2 }
 0x23d   :  { %v700_v58 = vpop.f32.mrb[7].mxu1  ;;  %1382 = vmatprep.subr.bf16.mxu1 %v1697_v0  ;;  %v1000_v0 = vsub.s32 3, %v987_v5 }
 0x23f   :  { %v1001_v27 = vrot.slane %v88_v7, %v1000_v0 }
 0x240   :  { %1383 = vmatpush3.bf16.msra.mxu1 %v1528_v3 }
 0x2f6   :  { %v937_v10 = vpop.f32.mrb[8].mxu1  ;;  %v978_v11 = vpop.f32.mrb[12].mxu0 }
 0x2f7   :  { %v938_v13 = vadd.f32 %v937_v10, %v695_v55  ;;  %v979_v14 = vadd.f32 %v978_v11, %v736_v42  ;;  %v939_v15 = vpop.f32.mrb[9].mxu1  ;;  %v980_v16 = vpop.f32.mrb[13].mxu0 }
 0x2f8   :  { %v940_v17 = vadd.f32 %v939_v15, %v697_v56  ;;  %v981_v18 = vadd.f32 %v980_v16, %v738_v43  ;;  %v941_v19 = vpop.f32.mrb[10].mxu1  ;;  %v982_v20 = vpop.f32.mrb[14].mxu0 }
 0x2f9   :  { %v1006_v21 = vadd.f32 %v989_v9, %v938_v13  ;;  %v942_v22 = vpop.f32.mrb[11].mxu1  ;;  %v983_v23 = vpop.f32.mrb[15].mxu0  ;;  %v1008_v32 = vadd.f32 %v997_v30, %v979_v14 }
 0x2fa   :  { %v1007_v24 = vadd.f32 %v993_v12, %v940_v17  ;;  %v1009_v29 = vadd.f32 %v1001_v27, %v981_v18 }
 0x2fb   :  { %v1260_v25 = vmul.f32 -1.442695, %v1006_v21 }
 0x2fc   :  { %v1261_v26 = vmul.f32 -1.442695, %v1007_v24  ;;  %v1262_v31 = vmul.f32 -1.442695, %v1009_v29 }
 0x2fd   :  { %1529 = vpow2.f32 %v1260_v25 }
 0x2fe   :  { %1531 = vpow2.f32 %v1261_v26 }
 0x2ff   :  { %1533 = vpow2.f32 %v1262_v31 }
 0x300   :  { %1535 = vtanh.f32 %v1008_v32 }
 0x307   :  { %v1530_v33 = vpop.eup %1529 }
 0x308   :  { %v1532_v34 = vpop.eup %1531  ;;  %v1013_v35 = vadd.f32 1.0, %v1530_v33 }
 0x309   :  { %v1019_v36 = vadd.f32 1.0, %v1532_v34  ;;  %v1534_v37 = vpop.eup %1533 }
 0x30a   :  { %1537 = vrcp.f32 %v1013_v35  ;;  %v1536_v38 = vpop.eup %1535  ;;  %v1026_v43 = vadd.f32 1.0, %v1534_v37 }
 0x30b   :  { %1539 = vrcp.f32 %v1019_v36 }
 0x30c   :  { %1541 = vrcp.f32 %v1026_v43 }
 0x314   :  { %v1538_v40 = vpop.eup %1537 }
 0x315   :  { %v1540_v41 = vpop.eup %1539  ;;  %v1030_v42 = vmul.f32 %v1538_v40, %v1536_v38 }
 0x316   :  { %v1029_v44 = vmul.f32 %v1540_v41, %v81_v39  ;;  %v1542_v46 = vpop.eup %1541 }
 0x318   :  { %v1031_v45 = vadd.f32 %v1030_v42, %v1029_v44 }
 0x31a   :  { %1138 = vst [vmem:[#allocation12 + $0x8] sm:$0xff] %v1031_v45  ;;  %1543 = vtanh.f32 %v1031_v45 }
 0x324   :  { %v1544_v47 = vpop.eup %1543 }
 0x325   :  { %v1033_v48 = vmul.f32 %v1544_v47, %v1542_v46 }
 0x327   :  { %v1034_v49 = vpack.c.bf16 %v1033_v48, %v1033_v48  ;;  %1137 = vst [vmem:[#allocation12] sm:$0xff] %v1033_v48 }
 0x329   :  { %1385 = vmatmul.mubr.bf16.vlgmr.msra.gmra.mrb[12].mxu1 %v1034_v49 }
 0x32a   :  { %1646 = shalt.err (!%p1643_p8)
}
 0x32b   :  { %s1647_s24 = scalar_lea.hbm %s1875_s6, 256 }
 0x32c   :  { %p1648_p9 = scmp.ne.s32.totalorder %s1875_s6, %s1647_s24  ;;  %p1651_p10 = scmp.lt.u32.totalorder %s1647_s24, %s1875_s6 }
 0x32e   :  { %p1653_p11 = pnand %p1651_p10, %p1648_p9 }
 0x330   :  { %1656 = shalt.err (!%p1653_p11)
}
 0x331   :  { %1158 = dma.vmem_to_hbm [thread:$0]  %s1156_s28, 256, %s1875_s6, [#allocation13]   ;;  %v1263_v50 = vld [vmem:[%s1873_s4 + $0x6] ss:$0 sm:$0xff] }
 0x332   :  { %s1701_s15 = smov [#allocation11]  }
 0x333   :  { %s1145_s16 = sshll.u32 %s1701_s15, 4  ;;  %s1146_s16 = int_to_ptr.vmem [resolvable:$true] %s1145_s16 }
 0x334   :  { %s1657_s17 = scalar_lea.vmem %s1146_s16, 128  ;;  %p1662_p13 = scmp.lt.s32.totalorder %s1146_s16, %s1146_s16 }
 0x335   :  { %p1658_p12 = scmp.ne.s32.totalorder %s1146_s16, %s1657_s17  ;;  %p1663_p0 = scmp.lt.s32.totalorder %s1657_s17, %s1657_s17 }
 0x337   :  { %p1664_p1 = por %p1663_p0, %p1662_p13 }
 0x339   :  { %p1665_p2 = pnand %p1664_p1, %p1658_p12 }
 0x3fc   :  { %v1123_v51 = vpop.f32.mrb[12].mxu1 }
 0x3fd   :  { %v1124_v52 = vadd.f32 %v1263_v50, %v1123_v51  ;;  %v1386_v53 = vpop.f32.mrb[13].mxu1 }
 0x3fe   :  { %v1126_v54 = vpop.f32.mrb[14].mxu1 }
 0x3ff   :  { %1545 = vtanh.f32 %v1124_v52  ;;  %v1387_v55 = vpop.f32.mrb[15].mxu1 }
 0x409   :  { %v1546_v56 = vpop.eup %1545 }
 0x40a   :  { %v1130_v57 = vmul.f32 0.5, %v1546_v56 }
 0x40c   :  { %1131 = vst [vmem:[#allocation11] sm:$0xff] %v1130_v57 }
 0x40d   :  { %1668 = shalt.err (!%p1665_p2)
}
 0x40e   :  { %s1669_s18 = scalar_lea.hbm %s1874_s5, 128 }
 0x40f   :  { %p1670_p3 = scmp.ne.s32.totalorder %s1874_s5, %s1669_s18  ;;  %p1673_p4 = scmp.lt.u32.totalorder %s1669_s18, %s1874_s5 }
 0x411   :  { %p1675_p5 = pnand %p1673_p4, %p1670_p3 }
 0x413   :  { %1678 = shalt.err (!%p1675_p5)
}
 0x414   :  { %1148 = dma.vmem_to_hbm [thread:$0]  %s1146_s16, 128, %s1874_s5, [#allocation5]  }
 0x415   :  { %1685 = dma.done.wait [#allocation5], 128  }
 0x416   :  { %1686 = vsyncadd [#allocation5], 4294967168 }
 0x417   :  { %1687 = dma.done.wait [#allocation13], 256  }
 0x418   :  { %1688 = vsyncadd [#allocation13], 4294967040 }
 0x419   :  { %1165 = vsyncpa [#allocation4], 1 }
 0x41a   :  { %1166 = vsyncpa [#allocation7], 1 }
 0x41b   :  { %1167 = vsyncpa [#allocation10], 1 }
 0x41c   :  { %1168 = vsyncpa [#allocation5], 1 }
 0x41d   :  { %1169 = vsyncpa [#allocation13], 1 }

</bundles_post_ra>
